<compile_context>
chip_gen: v6e
topology: v6e:2x2x1
jax: 0.10.0
libtpu: 0.0.40
codegen_flags: <defaults>
</compile_context>

<pallas_src>
import numpy as np
import jax
import jax.numpy as jnp
from jax.experimental import pallas as pl
from jax.experimental.pallas import tpu as pltpu

IN_FEATURES = 12
OUT_FEATURES = 64
TILE_M_MAX = 2048          # rows per grid step
VMEM_LIMIT_BYTES = 32 * 1024 * 1024


def _make_aoa_weights():
    """Deterministic Fourier weights, exactly as in the PyTorch __init__."""
    w = np.zeros((OUT_FEATURES, IN_FEATURES), dtype=np.complex64)
    for j in range(IN_FEATURES):
        for h in range(OUT_FEATURES):
            hh = h + 32
            if hh >= 64:
                hh = hh - 64
            w[h][j] = np.exp(-1j * 2 * np.pi * (j * hh / 64))
    return w  # (64, 12) complex64


def make_weight_arrays(w_complex):
    """Split complex weights (64, 12) into real transposed matrices (12, 64)."""
    w_re_t = jnp.asarray(np.real(w_complex).T.astype(np.float32))  # (12, 64)
    w_im_t = jnp.asarray(np.imag(w_complex).T.astype(np.float32))  # (12, 64)
    return w_re_t, w_im_t


def _cplx_linear_kernel(xr_ref, xi_ref, wrt_ref, wit_ref, yr_ref, yi_ref):
    # xr/xi: (tile_m, 12)   wrt/wit: (12, 64)   yr/yi: (tile_m, 64)
    xr = xr_ref[...]
    xi = xi_ref[...]
    wrt = wrt_ref[...]
    wit = wit_ref[...]
    yr = (jnp.dot(xr, wrt, preferred_element_type=jnp.float32)
          - jnp.dot(xi, wit, preferred_element_type=jnp.float32))
    yi = (jnp.dot(xr, wit, preferred_element_type=jnp.float32)
          + jnp.dot(xi, wrt, preferred_element_type=jnp.float32))
    yr_ref[...] = yr.astype(yr_ref.dtype)
    yi_ref[...] = yi.astype(yi_ref.dtype)


def _round_up(x, m):
    return ((x + m - 1) // m) * m


def aoa_fourier_net_new(x_re, x_im, w_re_t, w_im_t):
    """Apply the complex Fourier linear layer.

    x_re, x_im:     (..., 12) float32
    w_re_t, w_im_t: (12, 64)  float32 (from make_weight_arrays)
    returns (y_re, y_im): (..., 64) float32
    """
    lead = x_re.shape[:-1]
    M = int(np.prod(lead)) if lead else 1
    xr = x_re.reshape(M, IN_FEATURES)
    xi = x_im.reshape(M, IN_FEATURES)

    # Tile rows: multiple of 8 (sublane rule); ragged last block is masked by
    # Pallas, so no padding / extra HBM pass is needed.
    tile_m = min(TILE_M_MAX, _round_up(M, 8))
    grid = (pl.cdiv(M, tile_m),)

    flops = 8 * M * IN_FEATURES * OUT_FEATURES           # 4 real matmuls
    bytes_accessed = 4 * M * (2 * IN_FEATURES + 2 * OUT_FEATURES)

    y_re, y_im = pl.pallas_call(
        _cplx_linear_kernel,
        out_shape=(
            jax.ShapeDtypeStruct((M, OUT_FEATURES), jnp.float32),
            jax.ShapeDtypeStruct((M, OUT_FEATURES), jnp.float32),
        ),
        grid=grid,
        in_specs=[
            # x tiles stream along M.
            pl.BlockSpec((tile_m, IN_FEATURES), lambda i: (i, 0)),
            pl.BlockSpec((tile_m, IN_FEATURES), lambda i: (i, 0)),
            # Weights: constant block index -> resident in VMEM, no re-DMA.
            pl.BlockSpec((IN_FEATURES, OUT_FEATURES), lambda i: (0, 0)),
            pl.BlockSpec((IN_FEATURES, OUT_FEATURES), lambda i: (0, 0)),
        ],
        out_specs=[
            pl.BlockSpec((tile_m, OUT_FEATURES), lambda i: (i, 0)),
            pl.BlockSpec((tile_m, OUT_FEATURES), lambda i: (i, 0)),
        ],
        compiler_params=pltpu.CompilerParams(
            dimension_semantics=("parallel",),
            vmem_limit_bytes=VMEM_LIMIT_BYTES,
        ),
        cost_estimate=pl.CostEstimate(
            flops=flops, transcendentals=0, bytes_accessed=bytes_accessed),
    )(xr, xi, w_re_t, w_im_t)

    # Contiguous reshapes only (bitcasts) -- no extra HBM passes.
    y_re = y_re.reshape(*lead, OUT_FEATURES)
    y_im = y_im.reshape(*lead, OUT_FEATURES)
    return y_re, y_im


if __name__ == "__main__":
    # Deterministic parameters (fixed Fourier init, matches the module __init__).
    w_c = _make_aoa_weights()                      # (64, 12) complex
    w_re_t, w_im_t = make_weight_arrays(w_c)       # (12, 64) each

    # Example complex input: batch=2, seq=8, features=12.
    key = jax.random.PRNGKey(0)
    k1, k2 = jax.random.split(key)
    x_re = jax.random.normal(k1, (2, 8, IN_FEATURES), dtype=jnp.float32)
    x_im = jax.random.normal(k2, (2, 8, IN_FEATURES), dtype=jnp.float32)

    y_re, y_im = aoa_fourier_net_new(x_re, x_im, w_re_t, w_im_t)
    jax.block_until_ready((y_re, y_im))

    # Reference check against plain complex matmul (y = x @ W^T).
    x_c = np.asarray(x_re) + 1j * np.asarray(x_im)
    y_ref = x_c.reshape(-1, IN_FEATURES) @ w_c.T
    y_ref = y_ref.reshape(2, 8, OUT_FEATURES)
    np.testing.assert_allclose(np.asarray(y_re), np.real(y_ref), rtol=1e-4, atol=1e-4)
    np.testing.assert_allclose(np.asarray(y_im), np.imag(y_ref), rtol=1e-4, atol=1e-4)

    print("KERNEL_OK")
</pallas_src>

<mosaic_0001>
module attributes {stable_mosaic.version = 11 : i64} {
  func.func @_cplx_linear_kernel(%arg0: i32, %arg1: memref<16x12xf32, #tpu.memory_space<vmem>>, %arg2: memref<16x12xf32, #tpu.memory_space<vmem>>, %arg3: memref<12x64xf32, #tpu.memory_space<vmem>>, %arg4: memref<12x64xf32, #tpu.memory_space<vmem>>, %arg5: memref<16x64xf32, #tpu.memory_space<vmem>>, %arg6: memref<16x64xf32, #tpu.memory_space<vmem>>) attributes {dimension_semantics = [#tpu.dimension_semantics<parallel>], iteration_bounds = array<i64: 1>, scalar_prefetch = 0 : i64, scratch_operands = 0 : i64, tpu.core_type = #tpu.core_type<tc>, window_params = [{transform_indices = @transform_0, window_bounds = array<i64: 16, 12>}, {transform_indices = @transform_1, window_bounds = array<i64: 16, 12>}, {pipeline_mode = #tpu.pipeline_mode<synchronous>, transform_indices = @transform_2, window_bounds = array<i64: 12, 64>}, {pipeline_mode = #tpu.pipeline_mode<synchronous>, transform_indices = @transform_3, window_bounds = array<i64: 12, 64>}, {transform_indices = @transform_4, window_bounds = array<i64: 16, 64>}, {transform_indices = @transform_5, window_bounds = array<i64: 16, 64>}]} {
    %c0 = arith.constant 0 : index
    %c0_0 = arith.constant 0 : index
    %0 = vector.load %arg1[%c0, %c0_0] : memref<16x12xf32, #tpu.memory_space<vmem>>, vector<16x12xf32>
    %c0_1 = arith.constant 0 : index
    %c0_2 = arith.constant 0 : index
    %1 = vector.load %arg2[%c0_1, %c0_2] : memref<16x12xf32, #tpu.memory_space<vmem>>, vector<16x12xf32>
    %c0_3 = arith.constant 0 : index
    %c0_4 = arith.constant 0 : index
    %2 = vector.load %arg3[%c0_3, %c0_4] : memref<12x64xf32, #tpu.memory_space<vmem>>, vector<12x64xf32>
    %c0_5 = arith.constant 0 : index
    %c0_6 = arith.constant 0 : index
    %3 = vector.load %arg4[%c0_5, %c0_6] : memref<12x64xf32, #tpu.memory_space<vmem>>, vector<12x64xf32>
    %cst = arith.constant dense<0.000000e+00> : vector<16x64xf32>
    %4 = tpu.matmul %0, %2, %cst {dimension_numbers = #tpu.dot_dimension_numbers<[1], [0], [0], [1], [0, 0, 1, 1], [], []>} : vector<16x12xf32>, vector<12x64xf32>, vector<16x64xf32> -> vector<16x64xf32>
    %cst_7 = arith.constant dense<0.000000e+00> : vector<16x64xf32>
    %5 = tpu.matmul %1, %3, %cst_7 {dimension_numbers = #tpu.dot_dimension_numbers<[1], [0], [0], [1], [0, 0, 1, 1], [], []>} : vector<16x12xf32>, vector<12x64xf32>, vector<16x64xf32> -> vector<16x64xf32>
    %6 = arith.subf %4, %5 : vector<16x64xf32>
    %cst_8 = arith.constant dense<0.000000e+00> : vector<16x64xf32>
    %7 = tpu.matmul %0, %3, %cst_8 {dimension_numbers = #tpu.dot_dimension_numbers<[1], [0], [0], [1], [0, 0, 1, 1], [], []>} : vector<16x12xf32>, vector<12x64xf32>, vector<16x64xf32> -> vector<16x64xf32>
    %cst_9 = arith.constant dense<0.000000e+00> : vector<16x64xf32>
    %8 = tpu.matmul %1, %2, %cst_9 {dimension_numbers = #tpu.dot_dimension_numbers<[1], [0], [0], [1], [0, 0, 1, 1], [], []>} : vector<16x12xf32>, vector<12x64xf32>, vector<16x64xf32> -> vector<16x64xf32>
    %9 = arith.addf %7, %8 : vector<16x64xf32>
    %c0_10 = arith.constant 0 : index
    %c0_11 = arith.constant 0 : index
    %10 = vector.load %arg5[%c0_10, %c0_11] : memref<16x64xf32, #tpu.memory_space<vmem>>, vector<16x64xf32>
    tpu.vector_store %arg5[%c0_10, %c0_11], %6 {strides = array<i32>} : memref<16x64xf32, #tpu.memory_space<vmem>>, vector<16x64xf32>,
    %c0_12 = arith.constant 0 : index
    %c0_13 = arith.constant 0 : index
    %11 = vector.load %arg6[%c0_12, %c0_13] : memref<16x64xf32, #tpu.memory_space<vmem>>, vector<16x64xf32>
    tpu.vector_store %arg6[%c0_12, %c0_13], %9 {strides = array<i32>} : memref<16x64xf32, #tpu.memory_space<vmem>>, vector<16x64xf32>,
    return
  }
  func.func @transform_0(%arg0: i32) -> (i32, i32) {
    %c0_i32 = arith.constant 0 : i32
    %c0_i32_0 = arith.constant 0 : i32
    return %arg0, %c0_i32 : i32, i32
  }
  func.func @transform_1(%arg0: i32) -> (i32, i32) {
    %c0_i32 = arith.constant 0 : i32
    %c0_i32_0 = arith.constant 0 : i32
    return %arg0, %c0_i32 : i32, i32
  }
  func.func @transform_2(%arg0: i32) -> (i32, i32) {
    %c0_i32 = arith.constant 0 : i32
    %c0_i32_0 = arith.constant 0 : i32
    %c0_i32_1 = arith.constant 0 : i32
    return %c0_i32, %c0_i32_0 : i32, i32
  }
  func.func @transform_3(%arg0: i32) -> (i32, i32) {
    %c0_i32 = arith.constant 0 : i32
    %c0_i32_0 = arith.constant 0 : i32
    %c0_i32_1 = arith.constant 0 : i32
    return %c0_i32, %c0_i32_0 : i32, i32
  }
  func.func @transform_4(%arg0: i32) -> (i32, i32) {
    %c0_i32 = arith.constant 0 : i32
    %c0_i32_0 = arith.constant 0 : i32
    return %arg0, %c0_i32 : i32, i32
  }
  func.func @transform_5(%arg0: i32) -> (i32, i32) {
    %c0_i32 = arith.constant 0 : i32
    %c0_i32_0 = arith.constant 0 : i32
    return %arg0, %c0_i32 : i32, i32
  }
}

</mosaic_0001>

<bundles_post_ra>
// kernel: tpu_custom_call.1
= control target key start
LH: loop header
LB: loop body
LE: loop exit
PB: predicated region body
PF: predicated region fallthrough
CT: control target
= control target key end

     0   :  { %11 = vsyncpa [#allocation3], 0  ;;  %s734_s0 = inlined_call_operand.hbm [shape: f32[16,12], index: 0, kind: input, shape index: {}]   ;;  %s735_s1 = inlined_call_operand.hbm [shape: f32[16,12], index: 1, kind: input, shape index: {}]   ;;  %s736_s2 = inlined_call_operand.hbm [shape: f32[12,64], index: 2, kind: input, shape index: {}]   ;;  %s737_s3 = inlined_call_operand.hbm [shape: f32[12,64], index: 3, kind: input, shape index: {}]   ;;  %s738_s4 = inlined_call_operand.hbm [shape: f32[16,64], index: 4, kind: output, shape index: {0}]   ;;  %s739_s5 = inlined_call_operand.hbm [shape: f32[16,64], index: 5, kind: output, shape index: {1}]  }
   0x1   :  { %12 = vsyncpa [#allocation6], 0 }
   0x2   :  { %13 = vsyncpa [#allocation9], 0 }
   0x3   :  { %14 = vsyncpa [#allocation4], 0 }
   0x4   :  { %15 = vsyncpa [#allocation12], 0  ;;  %s640_s18 = smov [#allocation5]   ;;  %s641_s20 = smov [#allocation2]  }
   0x5   :  { %s33_s19 = sshll.u32 %s640_s18, 4  ;;  %s21_s21 = sshll.u32 %s641_s20, 4  ;;  %s34_s19 = int_to_ptr.vmem [resolvable:$true] %s33_s19  ;;  %s22_s21 = int_to_ptr.vmem [resolvable:$true] %s21_s21 }
   0x6   :  { %s518_s22 = scalar_lea.vmem %s34_s19, 256  ;;  %p523_p1 = scmp.lt.s32.totalorder %s34_s19, %s34_s19 }
   0x7   :  { %p519_p0 = scmp.ne.s32.totalorder %s34_s19, %s518_s22  ;;  %p524_p2 = scmp.lt.s32.totalorder %s518_s22, %s518_s22 }
   0x9   :  { %p525_p3 = por %p524_p2, %p523_p1 }
   0xb   :  { %p526_p4 = pnand %p525_p3, %p519_p0 }
   0xd   :  { %529 = shalt.err (!%p526_p4)
}
   0xe   :  { %s642_s23 = smov 128   ;;  %s643_s24 = smov 8  }
   0xf   :  { %39 = dma.hbm_to_vmem [thread:$0]  %s735_s1, 256, %s34_s19, [#allocation6], %s642_s23, %s642_s23, %s643_s24  }
  0x10   :  { %s538_s27 = scalar_lea.vmem %s22_s21, 256  ;;  %p543_p6 = scmp.lt.s32.totalorder %s22_s21, %s22_s21 }
  0x11   :  { %p539_p5 = scmp.ne.s32.totalorder %s22_s21, %s538_s27  ;;  %p544_p7 = scmp.lt.s32.totalorder %s538_s27, %s538_s27 }
  0x13   :  { %p545_p8 = por %p544_p7, %p543_p6 }
  0x15   :  { %p546_p9 = pnand %p545_p8, %p539_p5 }
  0x17   :  { %549 = shalt.err (!%p546_p9)
}
  0x18   :  { %27 = dma.hbm_to_vmem [thread:$0]  %s734_s0, 256, %s22_s21, [#allocation3], %s642_s23, %s642_s23, %s643_s24  }
  0x19   :  { %s644_s30 = smov [#allocation7]   ;;  %s645_s7 = smov [#allocation8]  }
  0x1a   :  { %s45_s6 = sshll.u32 %s644_s30, 4  ;;  %s57_s8 = sshll.u32 %s645_s7, 4  ;;  %s46_s6 = int_to_ptr.vmem [resolvable:$true] %s45_s6  ;;  %s58_s8 = int_to_ptr.vmem [resolvable:$true] %s57_s8 }
  0x1b   :  { %s558_s1 = scalar_lea.vmem %s46_s6, 256  ;;  %p563_p11 = scmp.lt.s32.totalorder %s46_s6, %s46_s6 }
  0x1c   :  { %p559_p10 = scmp.ne.s32.totalorder %s46_s6, %s558_s1  ;;  %p564_p12 = scmp.lt.s32.totalorder %s558_s1, %s558_s1 }
  0x1e   :  { %p565_p13 = por %p564_p12, %p563_p11 }
  0x20   :  { %p566_p0 = pnand %p565_p13, %p559_p10 }
  0x22   :  { %569 = shalt.err (!%p566_p0)
}
  0x23   :  { %51 = dma.hbm_to_vmem [thread:$0]  %s736_s2, 256, %s46_s6, [#allocation6], %s642_s23, %s642_s23, %s643_s24  }
  0x24   :  { %s578_s0 = scalar_lea.vmem %s58_s8, 256  ;;  %p583_p2 = scmp.lt.s32.totalorder %s58_s8, %s58_s8 }
  0x25   :  { %p579_p1 = scmp.ne.s32.totalorder %s58_s8, %s578_s0  ;;  %p584_p3 = scmp.lt.s32.totalorder %s578_s0, %s578_s0 }
  0x27   :  { %p585_p4 = por %p584_p3, %p583_p2 }
  0x29   :  { %p586_p5 = pnand %p585_p4, %p579_p1 }
  0x2b   :  { %589 = shalt.err (!%p586_p5)
}
  0x2c   :  { %63 = dma.hbm_to_vmem [thread:$0]  %s737_s3, 256, %s58_s8, [#allocation9], %s642_s23, %s642_s23, %s643_s24  }
  0x2d   :  { %630 = dma.done.wait [#allocation3], 256  }
  0x2e   :  { %631 = vsyncadd [#allocation3], 4294967040 }
  0x2f   :  { %632 = dma.done.wait [#allocation6], 512  }
  0x30   :  { %633 = vsyncadd [#allocation6], 4294966784 }
  0x31   :  { %634 = dma.done.wait [#allocation9], 256  }
  0x32   :  { %635 = vsyncadd [#allocation9], 4294967040  ;;  %vm91_vm0 = vcmask 1043456   ;;  %v81_v0 = vld [vmem:[#allocation7 + $0x8] sm:$0xf]  ;;  %v80_v2 = vld [vmem:[#allocation7] sm:$0xff] }
  0x33   :  { %v83_v1 = vld [vmem:[#allocation8 + $0x8] sm:$0xf]  ;;  %474 = vmatprep.subr.msk.mxu0 %vm91_vm0, %v81_v0  ;;  %v82_v3 = vld [vmem:[#allocation8] sm:$0xff]  ;;  %v76_v4 = vld [vmem:[#allocation2] sm:$0xff]  ;;  %vm84_vm1 = vcmask 97280   ;;  %vm406_vm2 = vcmask 523264  }
  0x34   :  { %481 = vmatprep.subr.msk.mxu1 %vm91_vm0, %v83_v1  ;;  %475 = vmatpush3.msk.msra.mxu0 %vm91_vm0, %v81_v0  ;;  %v78_v5 = vld [vmem:[#allocation5] sm:$0xff]  ;;  %v77_v6 = vld [vmem:[#allocation2 + $0x8] sm:$0xff]  ;;  %v79_v7 = vld [vmem:[#allocation5 + $0x8] sm:$0xff]  ;;  %s646_s2 = smov [#allocation10]   ;;  %s647_s13 = smov [#allocation11]  }
  0x35   :  { %482 = vmatpush3.msk.msra.mxu1 %vm91_vm0, %v83_v1  ;;  %476 = vmatprep.subr.mxu0 %v80_v2  ;;  %s416_s3 = sshll.u32 %s646_s2, 4  ;;  %s428_s14 = sshll.u32 %s647_s13, 4  ;;  %s417_s3 = int_to_ptr.vmem [resolvable:$true] %s416_s3  ;;  %s429_s14 = int_to_ptr.vmem [resolvable:$true] %s428_s14 }
  0x36   :  { %483 = vmatprep.subr.mxu1 %v82_v3  ;;  %477 = vmatpush3.msra.mxu0 %v80_v2  ;;  %s590_s15 = scalar_lea.vmem %s417_s3, 256  ;;  %p595_p7 = scmp.lt.s32.totalorder %s417_s3, %s417_s3 }
  0x37   :  { %478 = vmatprep.mubr.msk.f32.mxu0 %vm84_vm1, %v76_v4  ;;  %484 = vmatpush3.msra.mxu1 %v82_v3  ;;  %p591_p6 = scmp.ne.s32.totalorder %s417_s3, %s590_s15  ;;  %p596_p8 = scmp.lt.s32.totalorder %s590_s15, %s590_s15 }
  0x38   :  { %485 = vmatprep.mubr.msk.f32.mxu1 %vm84_vm1, %v78_v5  ;;  %479 = vmatmul.mubr.msk.f32.vlgmr.msra.gmra.mxu0 %vm84_vm1, %v77_v6 }
  0x39   :  { %486 = vmatmul.mubr.msk.f32.vlgmr.msra.gmra.mxu1 %vm84_vm1, %v79_v7  ;;  %488 = vmatprep.subr.msk.mxu0 %vm91_vm0, %v81_v0  ;;  %p597_p9 = por %p596_p8, %p595_p7 }
  0x3a   :  { %495 = vmatprep.subr.msk.mxu1 %vm91_vm0, %v83_v1  ;;  %489 = vmatpush3.msk.msra.mxu0 %vm91_vm0, %v81_v0 }
  0x3b   :  { %496 = vmatpush3.msk.msra.mxu1 %vm91_vm0, %v83_v1  ;;  %490 = vmatprep.subr.mxu0 %v80_v2  ;;  %p598_p10 = pnand %p597_p9, %p591_p6 }
  0x3c   :  { %497 = vmatprep.subr.mxu1 %v82_v3  ;;  %491 = vmatpush3.msra.mxu0 %v80_v2 }
  0x3d   :  { %492 = vmatprep.mubr.msk.f32.mxu0 %vm84_vm1, %v78_v5  ;;  %498 = vmatpush3.msra.mxu1 %v82_v3 }
  0x3e   :  { %499 = vmatprep.mubr.msk.f32.mxu1 %vm84_vm1, %v76_v4  ;;  %493 = vmatmul.mubr.msk.f32.vlgmr.msra.gmra.mxu0 %vm84_vm1, %v79_v7 }
  0x3f   :  { %500 = vmatmul.mubr.msk.f32.vlgmr.msra.gmra.mxu1 %vm84_vm1, %v77_v6 }
  0xf8   :  { %v480_v8 = vpop.f32.mrf.mxu0 }
  0xf9   :  { %v487_v9 = vpop.f32.mrf.mxu1 }
  0xfa   :  { %v255_v10 = vsub.f32 %v480_v8, %v487_v9  ;;  %v161_v11 = vpop.f32.mrf.mxu0 }
  0xfb   :  { %v245_v12 = vpop.f32.mrf.mxu1 }
  0xfc   :  { %v254_v13 = vsub.f32 %v161_v11, %v245_v12  ;;  %408 = vst.msk [vmem:[#allocation10 + $0x8] sm:$0xff] %vm406_vm2, %v255_v10 }
  0xfe   :  { %407 = vst.msk [vmem:[#allocation10] sm:$0xff] %vm406_vm2, %v254_v13  ;;  %v494_v14 = vpop.f32.mrf.mxu0 }
  0xff   :  { %v501_v15 = vpop.f32.mrf.mxu1 }
 0x100   :  { %601 = shalt.err (!%p598_p10)
}
 0x101   :  { %422 = dma.vmem_to_hbm [thread:$0]  %s417_s3, 256, %s738_s4, [#allocation4], %s642_s23, %s642_s23, %s643_s24   ;;  %v403_v16 = vadd.f32 %v501_v15, %v494_v14  ;;  %v322_v17 = vpop.f32.mrf.mxu0  ;;  %v397_v18 = vpop.f32.mrf.mxu1 }
 0x102   :  { %v398_v19 = vadd.f32 %v397_v18, %v322_v17  ;;  %s610_s18 = scalar_lea.vmem %s429_s14, 256  ;;  %p615_p12 = scmp.lt.s32.totalorder %s429_s14, %s429_s14 }
 0x103   :  { %410 = vst.msk [vmem:[#allocation11 + $0x8] sm:$0xff] %vm406_vm2, %v403_v16  ;;  %p611_p11 = scmp.ne.s32.totalorder %s429_s14, %s610_s18  ;;  %p616_p13 = scmp.lt.s32.totalorder %s610_s18, %s610_s18 }
 0x104   :  { %409 = vst.msk [vmem:[#allocation11] sm:$0xff] %vm406_vm2, %v398_v19 }
 0x105   :  { %p617_p0 = por %p616_p13, %p615_p12 }
 0x107   :  { %p618_p1 = pnand %p617_p0, %p611_p11 }
 0x109   :  { %621 = shalt.err (!%p618_p1)
}
 0x10a   :  { %434 = dma.vmem_to_hbm [thread:$0]  %s429_s14, 256, %s739_s5, [#allocation12], %s642_s23, %s642_s23, %s643_s24  }
 0x10b   :  { %636 = dma.done.wait [#allocation4], 256  }
 0x10c   :  { %637 = vsyncadd [#allocation4], 4294967040 }
 0x10d   :  { %638 = dma.done.wait [#allocation12], 256  }
 0x10e   :  { %639 = vsyncadd [#allocation12], 4294967040 }
 0x10f   :  { %441 = vsyncpa [#allocation3], 1 }
 0x110   :  { %442 = vsyncpa [#allocation6], 1 }
 0x111   :  { %443 = vsyncpa [#allocation9], 1 }
 0x112   :  { %444 = vsyncpa [#allocation4], 1 }
 0x113   :  { %445 = vsyncpa [#allocation12], 1 }

</bundles_post_ra>
